<compile_context>
chip_gen: v7x
topology: tpu7x:2x2x1
jax: 0.10.0
libtpu: 0.0.40
codegen_flags: <defaults>
</compile_context>

<pallas_src>
import functools
import math

import jax
import jax.numpy as jnp
from jax.experimental import pallas as pl
from jax.experimental.pallas import tpu as pltpu

EPS = 1e-5

# 3x3 conv taps in row-major (dy, dx) order; weight index (ky, kx) = (dy+1, dx+1).
_TAPS = tuple((dy, dx) for dy in (-1, 0, 1) for dx in (-1, 0, 1))


@functools.cache
def _roll_shift_sign():
    """One-time probe of the roll direction used by pltpu.roll on this chip.

    Returns s such that pltpu.roll(a, shift=(s*d) % n, axis=0)[p] == a[(p+d) % n]
    (jnp.roll convention => s == -1).  Must run outside jit the first time."""
    def probe(x_ref, o_ref):
        o_ref[...] = pltpu.roll(x_ref[...], shift=1, axis=0)

    x = jnp.broadcast_to(jnp.arange(8, dtype=jnp.float32)[:, None], (8, 128))
    out = pl.pallas_call(
        probe, out_shape=jax.ShapeDtypeStruct((8, 128), jnp.float32))(x)
    # jnp.roll convention: out[0] == x[-1] == 7 ; opposite convention: out[0] == 1.
    return -1 if float(out[0, 0]) > 3.5 else 1


def _group_norm(v, w, b, eps):
    """GroupNorm(num_groups=1): per-sample stats over (HW, C), per-channel affine.

    v: (B, HW, C); w, b: (1, 1, C); all f32."""
    cnt = v.shape[1] * v.shape[2]
    mu = jnp.sum(jnp.sum(v, axis=2, keepdims=True), axis=1, keepdims=True) / cnt
    d = v - mu
    var = jnp.sum(jnp.sum(d * d, axis=2, keepdims=True), axis=1, keepdims=True) / cnt
    return d * jax.lax.rsqrt(var + eps) * w + b


def _head_softmax(heads, approx):
    """Softmax across the head axis (a Python list of (HW, emb) slabs)."""
    m = heads[0]
    for a in heads[1:]:
        m = jnp.maximum(m, a)
    e = [jnp.exp(a - m) for a in heads]
    den = e[0]
    for a in e[1:]:
        den = den + a
    if approx:
        inv = pl.reciprocal(den, approx=True)   # EUP slot; frees the VPU divides
        return [a * inv for a in e]
    return [a / den for a in e]


def _residual_norm_kernel(x_ref, g1w_ref, g1b_ref, wqkv_ref, bqkv_ref,
                          wp_ref, bp_ref, g2w_ref, g2b_ref, out_ref, *,
                          n_head, emb, height, width, eps, roll_sign,
                          compute_dtype, approx_recip):
    f32 = jnp.float32
    b_tile, hw, c = x_ref.shape
    hidden = n_head * emb
    rows = b_tile * hw

    x3 = x_ref[...]                                        # (B, HW, C) f32

    # ---- GroupNorm(1, C) of the input, per sample ---------------------------
    xn = _group_norm(x3, g1w_ref[...], g1b_ref[...], eps)
    xn2 = xn.reshape(rows, c)                              # stacked samples

    # ---- 3x3 tap machinery: sublane rolls + border masks --------------------
    # Masks depend only on the in-image pixel position, so they repeat per
    # sample; any roll that crosses a sample boundary lands on a masked
    # (out-of-image) tap, hence rolling the stacked tensor is safe.
    flat = jax.lax.broadcasted_iota(jnp.int32, (rows, 1), 0)
    ph = (flat % hw) // width
    pw = flat % width
    masks = []
    for dy, dx in _TAPS:
        masks.append((ph + dy >= 0) & (ph + dy < height) &
                     (pw + dx >= 0) & (pw + dx < width))

    def shift_tap(a, t):
        # Returns s with s[p] = a[p + dy*width + dx] at valid taps, else 0.
        dy, dx = _TAPS[t]
        if dy == 0 and dx == 0:
            return a
        shift = (roll_sign * (dy * width + dx)) % rows
        rolled = pltpu.roll(a, shift=shift, axis=0) if shift else a
        return jnp.where(masks[t], rolled, 0.0)

    # ---- QKV 3x3 conv: one fused (C, 3*hidden) MXU dot per tap --------------
    # TODO(synk): for C << 128, concatenating the 9 shifted taps into a single
    # (rows, 9*C) im2col operand and doing one dot would cut MXU passes further;
    # kept per-tap here to avoid unaligned minor-dim concatenation at C < 128.
    def qkv_tap(t):
        xs = shift_tap(xn2, t).astype(compute_dtype)
        return jnp.dot(xs, wqkv_ref[t], preferred_element_type=f32)

    qkv = qkv_tap(0)
    for t in range(1, 9):
        qkv = qkv + qkv_tap(t)
    qkv = qkv + bqkv_ref[...]                              # (rows, 3*hidden) f32

    # ---- linear attention (softmax over the head axis), per sample ----------
    y_rows = []
    for b in range(b_tile):
        r0 = b * hw

        def head_slices(base, r0=r0):
            return [qkv[r0:r0 + hw, base + hh * emb: base + (hh + 1) * emb]
                    for hh in range(n_head)]

        q_h = head_slices(0)
        k_h = head_slices(hidden)
        v_h = head_slices(2 * hidden)
        q_sm = _head_softmax(q_h, approx_recip)            # new_Q.softmax(-2)
        k_sm = _head_softmax(k_h, approx_recip)            # new_K.softmax(-1)
        y_heads = []
        for h1 in range(n_head):
            # KV[e, h1, h2] = sum_p V[p, h1, e] * K_sm[p, h2, e]
            kv = [jnp.sum(v_h[h1] * k_sm[h2], axis=0, keepdims=True)
                  for h2 in range(n_head)]
            yh = kv[0] * q_sm[0]                           # (HW, emb)
            for h2 in range(1, n_head):
                yh = yh + kv[h2] * q_sm[h2]
            y_heads.append(yh)
        y_rows.append(jnp.concatenate(y_heads, axis=1))    # (HW, hidden)
    y = y_rows[0] if b_tile == 1 else jnp.concatenate(y_rows, axis=0)

    # ---- proj 3x3 conv (hidden -> C): matmul-then-shift ---------------------
    y_mx = y.astype(compute_dtype)

    def proj_tap(t):
        z = jnp.dot(y_mx, wp_ref[t], preferred_element_type=f32)   # (rows, C)
        return shift_tap(z, t)

    p = proj_tap(0)
    for t in range(1, 9):
        p = p + proj_tap(t)
    p = p + bp_ref[...]

    # ---- GroupNorm(1, C) + residual add --------------------------------------
    p3 = p.reshape(b_tile, hw, c)
    out = _group_norm(p3, g2w_ref[...], g2b_ref[...], eps) + x3
    out_ref[...] = out.astype(out_ref.dtype)


def residual_norm_forward(x, params, *, n_head=4, emb=256, eps=EPS,
                          mxu_dtype=jnp.bfloat16, b_tile=None):
    """Pallas forward of Residual_Norm (linear_attn=True). x: (N, C, H, W)."""
    # TODO(synk): the linear_attn=False (quadratic softmax attention) branch of
    # the PyTorch module is not implemented here.
    n, c, h, w = x.shape
    hw = h * w
    hidden = n_head * emb

    if b_tile is None:
        # Batch a few samples per grid step so matmul M = b_tile*HW fills the
        # MXU, but keep >= 2 grid steps when possible (v7x has 2 TensorCores).
        target = 4 if n >= 8 else max(1, n // 2)
        b_tile = 1
        for cand in range(min(target, n), 0, -1):
            if n % cand == 0:
                b_tile = cand
                break
    assert n % b_tile == 0, (n, b_tile)

    roll_sign = _roll_shift_sign()

    x_flat = jnp.transpose(x, (0, 2, 3, 1)).reshape(n, hw, c).astype(jnp.float32)

    def taps_in(wt):                     # (O, I, 3, 3) -> (9, I, O) per-tap RHS
        o, i = wt.shape[0], wt.shape[1]
        return jnp.transpose(wt, (2, 3, 1, 0)).reshape(9, i, o)

    wqkv = jnp.concatenate(
        [taps_in(params["wq"]), taps_in(params["wk"]), taps_in(params["wv"])],
        axis=2).astype(mxu_dtype)                               # (9, C, 3*hidden)
    bqkv = jnp.concatenate(
        [params["bq"], params["bk"], params["bv"]]
    ).reshape(1, 3 * hidden).astype(jnp.float32)
    wp = taps_in(params["wp"]).astype(mxu_dtype)                # (9, hidden, C)
    bp = params["bp"].reshape(1, c).astype(jnp.float32)

    gnp = lambda a: a.reshape(1, 1, c).astype(jnp.float32)

    args = (x_flat, gnp(params["gn1_w"]), gnp(params["gn1_b"]),
            wqkv, bqkv, wp, bp, gnp(params["gn2_w"]), gnp(params["gn2_b"]))

    const2 = lambda i: (0, 0)
    const3 = lambda i: (0, 0, 0)
    in_specs = [
        pl.BlockSpec((b_tile, hw, c), lambda i: (i, 0, 0)),               # x
        pl.BlockSpec((1, 1, c), const3), pl.BlockSpec((1, 1, c), const3),  # gn1
        pl.BlockSpec((9, c, 3 * hidden), const3),                          # Wqkv
        pl.BlockSpec((1, 3 * hidden), const2),                             # bqkv
        pl.BlockSpec((9, hidden, c), const3),                              # Wp
        pl.BlockSpec((1, c), const2),                                      # bp
        pl.BlockSpec((1, 1, c), const3), pl.BlockSpec((1, 1, c), const3),  # gn2
    ]
    # TODO(synk): on v7x, pipeline_mode=pl.Buffered(1) on the constant weight
    # specs would drop their double buffering; left at the default here.

    kernel = functools.partial(
        _residual_norm_kernel, n_head=n_head, emb=emb, height=h, width=w,
        eps=eps, roll_sign=roll_sign, compute_dtype=mxu_dtype,
        approx_recip=(mxu_dtype != jnp.float32))

    out = pl.pallas_call(
        kernel,
        out_shape=jax.ShapeDtypeStruct((n, hw, c), jnp.float32),
        grid_spec=pltpu.PrefetchScalarGridSpec(
            num_scalar_prefetch=0,
            grid=(n // b_tile,),
            in_specs=in_specs,
            out_specs=pl.BlockSpec((b_tile, hw, c), lambda i: (i, 0, 0)),
        ),
        compiler_params=pltpu.CompilerParams(
            dimension_semantics=("parallel",),
            # Above v5e's 16 MiB default scoped limit, well below v7x's 64 MiB.
            vmem_limit_bytes=32 * 1024 * 1024,
        ),
    )(*args)

    # TODO(synk): with C < 128 the (b_tile, hw, c) output stores are lane-masked;
    # a lane-dense (b_tile, hw*c) output layout would avoid that.
    return jnp.transpose(out.reshape(n, h, w, c), (0, 3, 1, 2))


def _reference(x, params, *, n_head=4, emb=256, eps=EPS):
    """Pure-JAX replica of the PyTorch Residual_Norm forward (linear_attn=True)."""
    n, c, h, w = x.shape
    hw = h * w
    hidden = n_head * emb
    hi = jax.lax.Precision.HIGHEST

    def gn(v, wt, b):
        mu = jnp.mean(v, axis=(1, 2, 3), keepdims=True)
        var = jnp.mean((v - mu) ** 2, axis=(1, 2, 3), keepdims=True)
        vn = (v - mu) * jax.lax.rsqrt(var + eps)
        return vn * wt[None, :, None, None] + b[None, :, None, None]

    def conv(v, wt, b):
        y = jax.lax.conv_general_dilated(
            v, wt, window_strides=(1, 1), padding=((1, 1), (1, 1)),
            dimension_numbers=("NCHW", "OIHW", "NCHW"), precision=hi)
        return y + b[None, :, None, None]

    xn = gn(x, params["gn1_w"], params["gn1_b"])
    q = conv(xn, params["wq"], params["bq"]).reshape(n, n_head, emb, hw)
    k = conv(xn, params["wk"], params["bk"]).reshape(n, n_head, emb, hw)
    v = conv(xn, params["wv"], params["bv"]).reshape(n, n_head, emb, hw)

    new_k = jnp.transpose(k, (0, 2, 3, 1))               # (N, emb, HW, n_head)
    new_q = jnp.transpose(q, (0, 2, 1, 3))               # (N, emb, n_head, HW)
    new_v = jnp.transpose(v, (0, 2, 1, 3))

    q_sm = jax.nn.softmax(new_q, axis=-2)
    k_sm = jax.nn.softmax(new_k, axis=-1)
    kv = jnp.matmul(new_v, k_sm, precision=hi)           # (N, emb, n_head, n_head)
    y = jnp.matmul(kv, q_sm, precision=hi)               # (N, emb, n_head, HW)

    new_y = jnp.concatenate([y[:, :, hh, :] for hh in range(n_head)], axis=1)
    new_y = new_y.reshape(n, hidden, h, w)
    out = conv(new_y, params["wp"], params["bp"])
    out = gn(out, params["gn2_w"], params["gn2_b"])
    return out + x


if __name__ == "__main__":
    key = jax.random.PRNGKey(0)
    ks = jax.random.split(key, 16)

    n, c, h, w = 2, 8, 8, 8
    n_head, emb = 4, 256          # Attention defaults: num_heads=4, embed_dim=256
    hidden = n_head * emb

    x = jax.random.normal(ks[0], (n, c, h, w), dtype=jnp.float32)

    def conv_weight(k_, o, i):
        bound = 1.0 / math.sqrt(i * 9)
        return jax.random.uniform(k_, (o, i, 3, 3), jnp.float32, -bound, bound)

    params = {
        "gn1_w": 1.0 + 0.1 * jax.random.normal(ks[1], (c,), jnp.float32),
        "gn1_b": 0.1 * jax.random.normal(ks[2], (c,), jnp.float32),
        "wq": conv_weight(ks[3], hidden, c),
        "bq": 0.1 * jax.random.normal(ks[4], (hidden,), jnp.float32),
        "wk": conv_weight(ks[5], hidden, c),
        "bk": 0.1 * jax.random.normal(ks[6], (hidden,), jnp.float32),
        "wv": conv_weight(ks[7], hidden, c),
        "bv": 0.1 * jax.random.normal(ks[8], (hidden,), jnp.float32),
        "wp": conv_weight(ks[9], c, hidden),
        "bp": 0.1 * jax.random.normal(ks[10], (c,), jnp.float32),
        "gn2_w": 1.0 + 0.1 * jax.random.normal(ks[11], (c,), jnp.float32),
        "gn2_b": 0.1 * jax.random.normal(ks[12], (c,), jnp.float32),
    }

    ref = _reference(x, params, n_head=n_head, emb=emb)

    # f32 MXU path (exact divides), one sample per grid step: tight check.
    out_f32 = residual_norm_forward(x, params, n_head=n_head, emb=emb,
                                    mxu_dtype=jnp.float32)
    out_f32 = jax.block_until_ready(out_f32)
    assert out_f32.shape == (n, c, h, w), out_f32.shape
    err_f32 = float(jnp.max(jnp.abs(out_f32 - ref)))
    assert err_f32 < 1e-2, err_f32

    # Default fast path: bf16 MXU operands + approx reciprocal, two samples per
    # grid step (exercises the stacked-batch tiling).  Looser tolerance for bf16.
    out_bf16 = residual_norm_forward(x, params, n_head=n_head, emb=emb, b_tile=2)
    out_bf16 = jax.block_until_ready(out_bf16)
    err_bf16 = float(jnp.max(jnp.abs(out_bf16 - ref)))
    assert err_bf16 < 0.25, err_bf16

    print("KERNEL_OK")
</pallas_src>

<mosaic_0001>
module attributes {stable_mosaic.version = 11 : i64} {
  func.func @probe(%arg0: memref<8x128xf32, #tpu.memory_space<vmem>>, %arg1: memref<8x128xf32, #tpu.memory_space<vmem>>) attributes {dimension_semantics = [], scalar_prefetch = 0 : i64, scratch_operands = 0 : i64, tpu.core_type = #tpu.core_type<tc>} {
    %c0 = arith.constant 0 : index
    %c0_0 = arith.constant 0 : index
    %0 = vector.load %arg0[%c0, %c0_0] : memref<8x128xf32, #tpu.memory_space<vmem>>, vector<8x128xf32>
    %c1_i32 = arith.constant 1 : i32
    %1 = tpu.dynamic_rotate %0 by %c1_i32 dim 0 : vector<8x128xf32>, i32 -> vector<8x128xf32>
    %c0_1 = arith.constant 0 : index
    %c0_2 = arith.constant 0 : index
    %2 = vector.load %arg1[%c0_1, %c0_2] : memref<8x128xf32, #tpu.memory_space<vmem>>, vector<8x128xf32>
    tpu.vector_store %arg1[%c0_1, %c0_2], %1 {strides = array<i32>} : memref<8x128xf32, #tpu.memory_space<vmem>>, vector<8x128xf32>,
    return
  }
}

</mosaic_0001>

<bundles_post_ra>
// kernel: tpu_custom_call.1
= control target key start
LH: loop header
LB: loop body
LE: loop exit
PB: predicated region body
PF: predicated region fallthrough
CT: control target
= control target key end

     0   :  { %6 = vsyncpa [#allocation3], 0  ;;  %s125_s0 = inlined_call_operand.hbm [shape: f32[8,128], index: 0, kind: input, shape index: {}]   ;;  %s126_s1 = inlined_call_operand.hbm [shape: f32[8,128], index: 1, kind: output, shape index: {}]  }
   0x1   :  { %7 = vsyncpa [#allocation4], 0  ;;  %s89_s6 = smov [#allocation2]   ;;  %s41_s10 = scalar_lea.hbm %s125_s0, 128 }
   0x2   :  { %s14_s7 = sshll.u32 %s89_s6, 4  ;;  %p42_p0 = scmp.ne.s32.totalorder %s125_s0, %s41_s10  ;;  %s15_s7 = int_to_ptr.vmem [resolvable:$true] %s14_s7 }
   0x3   :  { %p45_p1 = scmp.lt.u32.totalorder %s41_s10, %s125_s0 }
   0x5   :  { %p47_p2 = pnand %p45_p1, %p42_p0 }
   0x7   :  { %50 = shalt.err (!%p47_p2)
}
   0x8   :  { %s51_s15 = scalar_lea.vmem %s15_s7, 128  ;;  %p56_p4 = scmp.lt.s32.totalorder %s15_s7, %s15_s7 }
   0x9   :  { %p52_p3 = scmp.ne.s32.totalorder %s15_s7, %s51_s15  ;;  %p57_p5 = scmp.lt.s32.totalorder %s51_s15, %s51_s15 }
   0xb   :  { %p58_p6 = por %p57_p5, %p56_p4 }
   0xd   :  { %p59_p7 = pnand %p58_p6, %p52_p3 }
   0xf   :  { %62 = shalt.err (!%p59_p7)
}
  0x10   :  { %17 = dma.hbm_to_vmem [thread:$0]  %s125_s0, 128, %s15_s7, [#allocation3]  }
  0x11   :  { %85 = dma.done.wait [#allocation3], 128  }
  0x12   :  { %86 = vsyncadd [#allocation3], 4294967168  ;;  %s90_s18 = smov [#allocation5]   ;;  %v21_v0 = vld [vmem:[#allocation2] sm:$0xff] }
  0x13   :  { %s30_s19 = sshll.u32 %s90_s18, 4  ;;  %v22_v1 = vrot.slane %v21_v0, 7  ;;  %s31_s19 = int_to_ptr.vmem [resolvable:$true] %s30_s19 }
  0x14   :  { %s63_s20 = scalar_lea.vmem %s31_s19, 128  ;;  %p68_p9 = scmp.lt.s32.totalorder %s31_s19, %s31_s19 }
  0x15   :  { %23 = vst [vmem:[#allocation5] sm:$0xff] %v22_v1  ;;  %p64_p8 = scmp.ne.s32.totalorder %s31_s19, %s63_s20  ;;  %p69_p10 = scmp.lt.s32.totalorder %s63_s20, %s63_s20 }
  0x17   :  { %p70_p11 = por %p69_p10, %p68_p9 }
  0x19   :  { %p71_p12 = pnand %p70_p11, %p64_p8 }
  0x1b   :  { %74 = shalt.err (!%p71_p12)
}
  0x1c   :  { %s75_s23 = scalar_lea.hbm %s126_s1, 128 }
  0x1d   :  { %p76_p13 = scmp.ne.s32.totalorder %s126_s1, %s75_s23  ;;  %p79_p0 = scmp.lt.u32.totalorder %s75_s23, %s126_s1 }
  0x1f   :  { %p81_p1 = pnand %p79_p0, %p76_p13 }
  0x21   :  { %84 = shalt.err (!%p81_p1)
}
  0x22   :  { %33 = dma.vmem_to_hbm [thread:$0]  %s31_s19, 128, %s126_s1, [#allocation4]  }
  0x23   :  { %87 = dma.done.wait [#allocation4], 128  }
  0x24   :  { %88 = vsyncadd [#allocation4], 4294967168 }
  0x25   :  { %37 = vsyncpa [#allocation3], 1 }
  0x26   :  { %38 = vsyncpa [#allocation4], 1 }

</bundles_post_ra>
